<compile_context>
chip_gen: v7x
topology: tpu7x:2x2x1
jax: 0.10.0
libtpu: 0.0.40
codegen_flags: <defaults>
</compile_context>

<pallas_src>
import jax
import jax.numpy as jnp
from jax import lax
from jax.experimental import pallas as pl
from jax.experimental.pallas import tpu as pltpu


def _round_up(x, m):
    return ((x + m - 1) // m) * m


# ----------------------------- Pallas kernel ------------------------------ #
def _make_conv3x3_kernel(OC, Wp, TQ, num_tiles):
    """Fused 3x3 conv + bias + ReLU as 9 shifted, accumulating MXU dots."""

    def kernel(x_ref, w_ref, b_ref, o_ref):
        # x_ref: (Cp, Lin)    bf16  whole batch, flat zero-padded, lane-concat
        # w_ref: (9, OC, Cp)  bf16  tap-major weights (channels zero-padded)
        # b_ref: (OC, 1)      f32   bias
        # o_ref: (OC, TQ)     f32   lane-dense output tile
        if num_tiles == 1:
            base = 0                                           # static slices
        else:
            base = pl.multiple_of(pl.program_id(0) * TQ, 128)  # dynamic tile base
        acc = jnp.zeros((OC, TQ), jnp.float32)
        for kh in range(3):
            for kw in range(3):
                off = kh * Wp + kw                             # static tap offset
                tap = x_ref[:, pl.ds(base + off, TQ)]          # (Cp, TQ)
                acc = acc + jnp.dot(w_ref[kh * 3 + kw], tap,
                                    preferred_element_type=jnp.float32)
        o_ref[...] = jnp.maximum(acc + b_ref[...], 0.0).astype(o_ref.dtype)

    return kernel


# Max output lanes per grid step.  Bounds the per-step output block and gives
# v7x multiple "parallel" steps on big images; collapses to one step when the
# whole batch fits.
# TODO(synk): for very large H*W the whole-batch input canvas should itself be
# halo-tiled via manual DMA instead of staying fully VMEM-resident.
_TQ_CAP = 2048


def _conv3x3_relu_forward(x, w_packed, b2d):
    """Conv2d(C->OC, 3x3, stride 1, pad 1) + ReLU.  NCHW in / NCHW out."""
    N, C, H, W = x.shape
    _, OC, Cp = w_packed.shape
    Hp, Wp = H + 2, W + 2
    P = Hp * Wp                                    # padded pixels per image
    off_max = 2 * Wp + 2                           # largest static tap offset
    seg = _round_up(P + Wp + 1, 128)               # per-image lane stride
    Wout = N * seg                                 # useful output lanes (batch folded)
    TQ = Wout if Wout <= _TQ_CAP else _TQ_CAP      # output tile (multiple of 128)
    Wout_p = _round_up(Wout, TQ)                   # tiled output width
    Lin = _round_up(Wout_p + off_max, 128)         # input lanes incl. shift headroom
    num_tiles = Wout_p // TQ

    # Single fused pad chain (under jit): zero border -> flatten -> place each
    # image at lane n*seg + (Wp+1) so tap (kh,kw) becomes the static lane
    # offset kh*Wp+kw -> pad channels to Cp and lanes to Lin -> cast to bf16.
    xp = jnp.pad(x, ((0, 0), (0, 0), (1, 1), (1, 1)))             # (N, C, Hp, Wp)
    xf = jnp.pad(xp.reshape(N, C, P),
                 ((0, 0), (0, 0), (Wp + 1, seg - P - (Wp + 1))))  # (N, C, seg)
    xf = jnp.transpose(xf, (1, 0, 2)).reshape(C, Wout)            # images on lanes
    xf = jnp.pad(xf, ((0, Cp - C), (0, Lin - Wout))).astype(jnp.bfloat16)

    # Honest VMEM budget from actual (padded) block sizes + fixed headroom.
    vmem_bytes = int(min(
        2 * (_round_up(Cp, 16) * Lin * 2                         # input canvas bf16
             + 9 * _round_up(OC, 16) * _round_up(Cp, 128) * 2    # weight tiles bf16
             + _round_up(OC, 8) * TQ * 4)                        # output tile f32
        + (4 << 20),
        96 * 1024 * 1024))

    out = pl.pallas_call(
        _make_conv3x3_kernel(OC, Wp, TQ, num_tiles),
        out_shape=jax.ShapeDtypeStruct((OC, Wout_p), jnp.float32),
        grid_spec=pltpu.PrefetchScalarGridSpec(
            num_scalar_prefetch=0,
            grid=(num_tiles,),
            in_specs=[
                pl.BlockSpec((Cp, Lin), lambda j: (0, 0)),        # batch canvas resident
                pl.BlockSpec((9, OC, Cp), lambda j: (0, 0, 0)),   # weights resident
                pl.BlockSpec((OC, 1), lambda j: (0, 0)),          # bias resident
            ],
            out_specs=pl.BlockSpec((OC, TQ), lambda j: (0, j)),
        ),
        compiler_params=pltpu.CompilerParams(
            dimension_semantics=("parallel",),    # v7x: shard output tiles across TCs
            vmem_limit_bytes=vmem_bytes,
        ),
    )(xf, w_packed, b2d)

    # Crop back to NCHW: per-image segment -> padded grid -> interior.
    out = out[:, :Wout].reshape(OC, N, seg).transpose(1, 0, 2)    # (N, OC, seg)
    out = out[:, :, :P].reshape(N, OC, Hp, Wp)[:, :, 1:H + 1, 1:W + 1]
    return out


conv3x3_relu_pallas = jax.jit(_conv3x3_relu_forward)


# -------------------------------- wrapper ---------------------------------- #
class PallasWrapper:
    """Mirror of the PyTorch Wrapper: forward(x) = model(x)."""

    def __init__(self, model):
        self.model = model

    def __call__(self, x):
        return self.model(x)


class ConvReLUFeatureModel:
    """Synthetic wrapped model: Conv2d(C->OC, 3x3, pad=1) + ReLU (Pallas)."""

    def __init__(self, c_in, c_out, key):
        k1, k2 = jax.random.split(key)
        fan_in = c_in * 3 * 3
        bound = (1.0 / fan_in) ** 0.5
        self.weight = jax.random.uniform(
            k1, (c_out, c_in, 3, 3), jnp.float32, -bound, bound)
        self.bias = jax.random.uniform(k2, (c_out,), jnp.float32, -bound, bound)
        self.c_in, self.c_out = c_in, c_out
        # Constant prep hoisted out of the per-call path (perf review): pack
        # tap-major (9, OC, Cp) bf16 weights with the channel/K dim zero-padded
        # to 16 (bf16 sublane pack) so every MXU operand is tile-aligned.
        cp = max(16, _round_up(c_in, 16))
        w_t = jnp.transpose(self.weight, (2, 3, 0, 1)).reshape(9, c_out, c_in)
        self.w_packed = jnp.pad(
            w_t, ((0, 0), (0, 0), (0, cp - c_in))).astype(jnp.bfloat16)
        self.b2d = self.bias.reshape(c_out, 1).astype(jnp.float32)

    def __call__(self, x):
        assert x.shape[1] == self.c_in
        return conv3x3_relu_pallas(x, self.w_packed, self.b2d)


# ------------------------------- reference --------------------------------- #
def _reference(x, weight, bias):
    # Same bf16 operand rounding as the kernel, f32 accumulation.
    xb = x.astype(jnp.bfloat16).astype(jnp.float32)
    wb = weight.astype(jnp.bfloat16).astype(jnp.float32)
    y = lax.conv_general_dilated(
        xb, wb, window_strides=(1, 1), padding="SAME",
        dimension_numbers=("NCHW", "OIHW", "NCHW"),
        precision=lax.Precision.HIGHEST)
    return jnp.maximum(y + bias.reshape(1, -1, 1, 1), 0.0)


if __name__ == "__main__":
    key = jax.random.PRNGKey(0)
    k_x, k_m = jax.random.split(key)

    N, C, H, W = 2, 4, 16, 16
    x = jax.random.normal(k_x, (N, C, H, W), jnp.float32)

    model = ConvReLUFeatureModel(c_in=C, c_out=8, key=k_m)
    wrapper = PallasWrapper(model)      # forward(x) = model(x), like torch Wrapper

    out = jax.block_until_ready(wrapper(x))

    ref = jax.block_until_ready(_reference(x, model.weight, model.bias))
    assert out.shape == (N, 8, H, W), out.shape
    assert jnp.allclose(out, ref, atol=2e-3, rtol=2e-3), "mismatch vs reference"

    print("KERNEL_OK")
</pallas_src>

<mosaic_0001>
module attributes {stable_mosaic.version = 11 : i64} {
  func.func @kernel(%arg0: i32, %arg1: memref<16x896xbf16, #tpu.memory_space<vmem>>, %arg2: memref<9x8x16xbf16, #tpu.memory_space<vmem>>, %arg3: memref<8x1xf32, #tpu.memory_space<vmem>>, %arg4: memref<8x768xf32, #tpu.memory_space<vmem>>) attributes {dimension_semantics = [#tpu.dimension_semantics<parallel>], iteration_bounds = array<i64: 1>, scalar_prefetch = 0 : i64, scratch_operands = 0 : i64, tpu.core_type = #tpu.core_type<tc>, window_params = [{pipeline_mode = #tpu.pipeline_mode<synchronous>, transform_indices = @transform_0, window_bounds = array<i64: 16, 896>}, {pipeline_mode = #tpu.pipeline_mode<synchronous>, transform_indices = @transform_1, window_bounds = array<i64: 9, 8, 16>}, {pipeline_mode = #tpu.pipeline_mode<synchronous>, transform_indices = @transform_2, window_bounds = array<i64: 8, 1>}, {transform_indices = @transform_3, window_bounds = array<i64: 8, 768>}]} {
    %cst = arith.constant 0.000000e+00 : f32
    %0 = vector.broadcast %cst : f32 to vector<8x768xf32>
    %c0 = arith.constant 0 : index
    %c0_0 = arith.constant 0 : index
    %1 = vector.load %arg1[%c0, %c0_0] : memref<16x896xbf16, #tpu.memory_space<vmem>>, vector<16x768xbf16>
    %c0_1 = arith.constant 0 : index
    %c0_2 = arith.constant 0 : index
    %c0_3 = arith.constant 0 : index
    %2 = vector.load %arg2[%c0_1, %c0_2, %c0_3] : memref<9x8x16xbf16, #tpu.memory_space<vmem>>, vector<1x8x16xbf16>
    %3 = vector.shape_cast %2 : vector<1x8x16xbf16> to vector<8x16xbf16>
    %cst_4 = arith.constant dense<0.000000e+00> : vector<8x768xf32>
    %4 = tpu.matmul %3, %1, %cst_4 {dimension_numbers = #tpu.dot_dimension_numbers<[1], [0], [0], [1], [0, 0, 1, 1], [], []>} : vector<8x16xbf16>, vector<16x768xbf16>, vector<8x768xf32> -> vector<8x768xf32>
    %5 = arith.addf %0, %4 : vector<8x768xf32>
    %c0_5 = arith.constant 0 : index
    %c1 = arith.constant 1 : index
    %6 = vector.load %arg1[%c0_5, %c1] : memref<16x896xbf16, #tpu.memory_space<vmem>>, vector<16x768xbf16>
    %c1_6 = arith.constant 1 : index
    %c0_7 = arith.constant 0 : index
    %c0_8 = arith.constant 0 : index
    %7 = vector.load %arg2[%c1_6, %c0_7, %c0_8] : memref<9x8x16xbf16, #tpu.memory_space<vmem>>, vector<1x8x16xbf16>
    %8 = vector.shape_cast %7 : vector<1x8x16xbf16> to vector<8x16xbf16>
    %cst_9 = arith.constant dense<0.000000e+00> : vector<8x768xf32>
    %9 = tpu.matmul %8, %6, %cst_9 {dimension_numbers = #tpu.dot_dimension_numbers<[1], [0], [0], [1], [0, 0, 1, 1], [], []>} : vector<8x16xbf16>, vector<16x768xbf16>, vector<8x768xf32> -> vector<8x768xf32>
    %10 = arith.addf %5, %9 : vector<8x768xf32>
    %c0_10 = arith.constant 0 : index
    %c2 = arith.constant 2 : index
    %11 = vector.load %arg1[%c0_10, %c2] : memref<16x896xbf16, #tpu.memory_space<vmem>>, vector<16x768xbf16>
    %c2_11 = arith.constant 2 : index
    %c0_12 = arith.constant 0 : index
    %c0_13 = arith.constant 0 : index
    %12 = vector.load %arg2[%c2_11, %c0_12, %c0_13] : memref<9x8x16xbf16, #tpu.memory_space<vmem>>, vector<1x8x16xbf16>
    %13 = vector.shape_cast %12 : vector<1x8x16xbf16> to vector<8x16xbf16>
    %cst_14 = arith.constant dense<0.000000e+00> : vector<8x768xf32>
    %14 = tpu.matmul %13, %11, %cst_14 {dimension_numbers = #tpu.dot_dimension_numbers<[1], [0], [0], [1], [0, 0, 1, 1], [], []>} : vector<8x16xbf16>, vector<16x768xbf16>, vector<8x768xf32> -> vector<8x768xf32>
    %15 = arith.addf %10, %14 : vector<8x768xf32>
    %c0_15 = arith.constant 0 : index
    %c18 = arith.constant 18 : index
    %16 = vector.load %arg1[%c0_15, %c18] : memref<16x896xbf16, #tpu.memory_space<vmem>>, vector<16x768xbf16>
    %c3 = arith.constant 3 : index
    %c0_16 = arith.constant 0 : index
    %c0_17 = arith.constant 0 : index
    %17 = vector.load %arg2[%c3, %c0_16, %c0_17] : memref<9x8x16xbf16, #tpu.memory_space<vmem>>, vector<1x8x16xbf16>
    %18 = vector.shape_cast %17 : vector<1x8x16xbf16> to vector<8x16xbf16>
    %cst_18 = arith.constant dense<0.000000e+00> : vector<8x768xf32>
    %19 = tpu.matmul %18, %16, %cst_18 {dimension_numbers = #tpu.dot_dimension_numbers<[1], [0], [0], [1], [0, 0, 1, 1], [], []>} : vector<8x16xbf16>, vector<16x768xbf16>, vector<8x768xf32> -> vector<8x768xf32>
    %20 = arith.addf %15, %19 : vector<8x768xf32>
    %c0_19 = arith.constant 0 : index
    %c19 = arith.constant 19 : index
    %21 = vector.load %arg1[%c0_19, %c19] : memref<16x896xbf16, #tpu.memory_space<vmem>>, vector<16x768xbf16>
    %c4 = arith.constant 4 : index
    %c0_20 = arith.constant 0 : index
    %c0_21 = arith.constant 0 : index
    %22 = vector.load %arg2[%c4, %c0_20, %c0_21] : memref<9x8x16xbf16, #tpu.memory_space<vmem>>, vector<1x8x16xbf16>
    %23 = vector.shape_cast %22 : vector<1x8x16xbf16> to vector<8x16xbf16>
    %cst_22 = arith.constant dense<0.000000e+00> : vector<8x768xf32>
    %24 = tpu.matmul %23, %21, %cst_22 {dimension_numbers = #tpu.dot_dimension_numbers<[1], [0], [0], [1], [0, 0, 1, 1], [], []>} : vector<8x16xbf16>, vector<16x768xbf16>, vector<8x768xf32> -> vector<8x768xf32>
    %25 = arith.addf %20, %24 : vector<8x768xf32>
    %c0_23 = arith.constant 0 : index
    %c20 = arith.constant 20 : index
    %26 = vector.load %arg1[%c0_23, %c20] : memref<16x896xbf16, #tpu.memory_space<vmem>>, vector<16x768xbf16>
    %c5 = arith.constant 5 : index
    %c0_24 = arith.constant 0 : index
    %c0_25 = arith.constant 0 : index
    %27 = vector.load %arg2[%c5, %c0_24, %c0_25] : memref<9x8x16xbf16, #tpu.memory_space<vmem>>, vector<1x8x16xbf16>
    %28 = vector.shape_cast %27 : vector<1x8x16xbf16> to vector<8x16xbf16>
    %cst_26 = arith.constant dense<0.000000e+00> : vector<8x768xf32>
    %29 = tpu.matmul %28, %26, %cst_26 {dimension_numbers = #tpu.dot_dimension_numbers<[1], [0], [0], [1], [0, 0, 1, 1], [], []>} : vector<8x16xbf16>, vector<16x768xbf16>, vector<8x768xf32> -> vector<8x768xf32>
    %30 = arith.addf %25, %29 : vector<8x768xf32>
    %c0_27 = arith.constant 0 : index
    %c36 = arith.constant 36 : index
    %31 = vector.load %arg1[%c0_27, %c36] : memref<16x896xbf16, #tpu.memory_space<vmem>>, vector<16x768xbf16>
    %c6 = arith.constant 6 : index
    %c0_28 = arith.constant 0 : index
    %c0_29 = arith.constant 0 : index
    %32 = vector.load %arg2[%c6, %c0_28, %c0_29] : memref<9x8x16xbf16, #tpu.memory_space<vmem>>, vector<1x8x16xbf16>
    %33 = vector.shape_cast %32 : vector<1x8x16xbf16> to vector<8x16xbf16>
    %cst_30 = arith.constant dense<0.000000e+00> : vector<8x768xf32>
    %34 = tpu.matmul %33, %31, %cst_30 {dimension_numbers = #tpu.dot_dimension_numbers<[1], [0], [0], [1], [0, 0, 1, 1], [], []>} : vector<8x16xbf16>, vector<16x768xbf16>, vector<8x768xf32> -> vector<8x768xf32>
    %35 = arith.addf %30, %34 : vector<8x768xf32>
    %c0_31 = arith.constant 0 : index
    %c37 = arith.constant 37 : index
    %36 = vector.load %arg1[%c0_31, %c37] : memref<16x896xbf16, #tpu.memory_space<vmem>>, vector<16x768xbf16>
    %c7 = arith.constant 7 : index
    %c0_32 = arith.constant 0 : index
    %c0_33 = arith.constant 0 : index
    %37 = vector.load %arg2[%c7, %c0_32, %c0_33] : memref<9x8x16xbf16, #tpu.memory_space<vmem>>, vector<1x8x16xbf16>
    %38 = vector.shape_cast %37 : vector<1x8x16xbf16> to vector<8x16xbf16>
    %cst_34 = arith.constant dense<0.000000e+00> : vector<8x768xf32>
    %39 = tpu.matmul %38, %36, %cst_34 {dimension_numbers = #tpu.dot_dimension_numbers<[1], [0], [0], [1], [0, 0, 1, 1], [], []>} : vector<8x16xbf16>, vector<16x768xbf16>, vector<8x768xf32> -> vector<8x768xf32>
    %40 = arith.addf %35, %39 : vector<8x768xf32>
    %c0_35 = arith.constant 0 : index
    %c38 = arith.constant 38 : index
    %41 = vector.load %arg1[%c0_35, %c38] : memref<16x896xbf16, #tpu.memory_space<vmem>>, vector<16x768xbf16>
    %c8 = arith.constant 8 : index
    %c0_36 = arith.constant 0 : index
    %c0_37 = arith.constant 0 : index
    %42 = vector.load %arg2[%c8, %c0_36, %c0_37] : memref<9x8x16xbf16, #tpu.memory_space<vmem>>, vector<1x8x16xbf16>
    %43 = vector.shape_cast %42 : vector<1x8x16xbf16> to vector<8x16xbf16>
    %cst_38 = arith.constant dense<0.000000e+00> : vector<8x768xf32>
    %44 = tpu.matmul %43, %41, %cst_38 {dimension_numbers = #tpu.dot_dimension_numbers<[1], [0], [0], [1], [0, 0, 1, 1], [], []>} : vector<8x16xbf16>, vector<16x768xbf16>, vector<8x768xf32> -> vector<8x768xf32>
    %45 = arith.addf %40, %44 : vector<8x768xf32>
    %c0_39 = arith.constant 0 : index
    %c0_40 = arith.constant 0 : index
    %46 = vector.load %arg3[%c0_39, %c0_40] : memref<8x1xf32, #tpu.memory_space<vmem>>, vector<8x1xf32>
    %47 = vector.broadcast %46 : vector<8x1xf32> to vector<8x768xf32>
    %48 = arith.addf %45, %47 : vector<8x768xf32>
    %cst_41 = arith.constant 0.000000e+00 : f32
    %49 = vector.broadcast %cst_41 : f32 to vector<8x768xf32>
    %50 = arith.maximumf %48, %49 : vector<8x768xf32>
    %c0_42 = arith.constant 0 : index
    %c0_43 = arith.constant 0 : index
    %51 = vector.load %arg4[%c0_42, %c0_43] : memref<8x768xf32, #tpu.memory_space<vmem>>, vector<8x768xf32>
    tpu.vector_store %arg4[%c0_42, %c0_43], %50 {strides = array<i32>} : memref<8x768xf32, #tpu.memory_space<vmem>>, vector<8x768xf32>,
    return
  }
  func.func @transform_0(%arg0: i32) -> (i32, i32) {
    %c0_i32 = arith.constant 0 : i32
    %c0_i32_0 = arith.constant 0 : i32
    %c0_i32_1 = arith.constant 0 : i32
    return %c0_i32, %c0_i32_0 : i32, i32
  }
  func.func @transform_1(%arg0: i32) -> (i32, i32, i32) {
    %c0_i32 = arith.constant 0 : i32
    %c0_i32_0 = arith.constant 0 : i32
    %c0_i32_1 = arith.constant 0 : i32
    %c0_i32_2 = arith.constant 0 : i32
    return %c0_i32, %c0_i32_0, %c0_i32_1 : i32, i32, i32
  }
  func.func @transform_2(%arg0: i32) -> (i32, i32) {
    %c0_i32 = arith.constant 0 : i32
    %c0_i32_0 = arith.constant 0 : i32
    %c0_i32_1 = arith.constant 0 : i32
    return %c0_i32, %c0_i32_0 : i32, i32
  }
  func.func @transform_3(%arg0: i32) -> (i32, i32) {
    %c0_i32 = arith.constant 0 : i32
    %c0_i32_0 = arith.constant 0 : i32
    return %c0_i32, %arg0 : i32, i32
  }
}

</mosaic_0001>

<bundles_post_ra>
// kernel: _conv3x3_relu_forward.1
= control target key start
LH: loop header
LB: loop body
LE: loop exit
PB: predicated region body
PF: predicated region fallthrough
CT: control target
= control target key end

     0   :  { %v1594_v1 = vmov 0   ;;  %s1595_s16 = smov 127   ;;  %s1596_s27 = smov 126   ;;  %vm75_vm0 = vcmask 1039360   ;;  %vm88_vm1 = vcmask 130048   ;;  %vm387_vm2 = vcmask 1031168   ;;  %s1861_s0 = inlined_call_operand.vmem [shape: bf16[16,896], index: 0, kind: input, shape index: {}]   ;;  %s1862_s2 = inlined_call_operand.vmem [shape: f32[8,1], index: 2, kind: input, shape index: {}]   ;;  %s1863_s1 = inlined_call_operand.vmem [shape: bf16[9,8,16], index: 1, kind: input, shape index: {}]   ;;  %s1864_s3 = inlined_call_operand.vmem [shape: f32[8,768], index: 3, kind: output, shape index: {}]  }
   0x1   :  { %v1626_v0 = vld [vmem:[%s1861_s0 + $0x4] ss:$28 sps:$4 sm:$0xff]   ;;  %124 = vmatprep.mubr.bf16.mxu0 %v1594_v1  ;;  %165 = vmatprep.mubr.bf16.mxu1 %v1594_v1  ;;  %v1646_v4 = vld [vmem:[%s1861_s0 + $0xc] ss:$28 sps:$4 sm:$0xff]   ;;  %v1658_v6 = vld [vmem:[%s1861_s0 + $0x14] ss:$28 sps:$4 sm:$0xff]  }
   0x2   :  { %v1633_v2 = vld [vmem:[%s1861_s0] ss:$28 sps:$4 sm:$0xff]   ;;  %1583 = vset.pattern.permute.xlu0 %v1594_v1  ;;  %v1640_v3 = vld [vmem:[%s1861_s0 + $0x8] ss:$28 sps:$4 sm:$0xff]   ;;  %v1652_v5 = vld [vmem:[%s1861_s0 + $0x10] ss:$28 sps:$4 sm:$0xff]  }
   0x3   :  { %63 = vrot.lane.b32.xlu0 %v1626_v0, %s1595_s16  ;;  %61 = vrot.lane.b32.xlu1 %v1633_v2, %s1595_s16  ;;  %v1593_v7 = vld [vmem:[%s1861_s0 + $0x18] ss:$28 sps:$4 sm:$0xff]   ;;  %s1597_s28 = smov 110   ;;  %s1598_s0 = smov 109   ;;  %v1498_v8 = vld [vmem:[%s1862_s2] sm:$0xff]  ;;  %vm548_vm3 = vcmask 900096  }
   0x4   :  { %s1599_s29 = smov 108   ;;  %s1600_s30 = smov 92   ;;  %v1526_v15 = vld [vmem:[%s1863_s1 + $0x4] sm:$0xf]  ;;  %v21_v27 = vld [vmem:[%s1863_s1] sm:$0xf] }
   0x5   :  { %s1601_s4 = smov 91   ;;  %s1602_s5 = smov 90   ;;  %v1546_v39 = vld [vmem:[%s1863_s1 + $0x8] sm:$0xf]  ;;  %vm709_vm4 = vcmask 891904   ;;  %vm870_vm5 = vcmask 883712  }
   0x6   :  { %v1550_v51 = vld [vmem:[%s1863_s1 + $0xc] sm:$0xf]  ;;  %vm1031_vm6 = vcmask 752640   ;;  %vm1192_vm7 = vcmask 744448   ;;  %vm1353_vm8 = vcmask 736256  }
   0x7   :  { %65 = vrot.lane.b32.xlu0 %v1640_v3, %s1595_s16  ;;  %67 = vrot.lane.b32.xlu1 %v1646_v4, %s1595_s16 }
   0xb   :  { %69 = vrot.lane.b32.xlu0 %v1652_v5, %s1595_s16  ;;  %71 = vrot.lane.b32.xlu1 %v1658_v6, %s1595_s16 }
   0xf   :  { %73 = vrot.lane.b32.xlu0 %v1593_v7, %s1595_s16  ;;  %375 = vrot.lane.b32.xlu1 %v1626_v0, %s1596_s27 }
  0x13   :  { %377 = vrot.lane.b32.xlu0 %v1640_v3, %s1596_s27  ;;  %373 = vrot.lane.b32.xlu1 %v1633_v2, %s1596_s27 }
  0x17   :  { %379 = vrot.lane.b32.xlu0 %v1646_v4, %s1596_s27  ;;  %381 = vrot.lane.b32.xlu1 %v1652_v5, %s1596_s27 }
  0x1b   :  { %383 = vrot.lane.b32.xlu0 %v1658_v6, %s1596_s27  ;;  %385 = vrot.lane.b32.xlu1 %v1593_v7, %s1596_s27 }
  0x1f   :  { %536 = vrot.lane.b32.xlu0 %v1626_v0, %s1597_s28  ;;  %538 = vrot.lane.b32.xlu1 %v1640_v3, %s1597_s28 }
  0x23   :  { %540 = vrot.lane.b32.xlu0 %v1646_v4, %s1597_s28  ;;  %542 = vrot.lane.b32.xlu1 %v1652_v5, %s1597_s28 }
  0x27   :  { %534 = vrot.lane.b32.xlu0 %v1633_v2, %s1597_s28  ;;  %544 = vrot.lane.b32.xlu1 %v1658_v6, %s1597_s28 }
  0x2b   :  { %546 = vrot.lane.b32.xlu0 %v1593_v7, %s1597_s28  ;;  %697 = vrot.lane.b32.xlu1 %v1626_v0, %s1598_s0 }
  0x2f   :  { %699 = vrot.lane.b32.xlu0 %v1640_v3, %s1598_s0  ;;  %695 = vrot.lane.b32.xlu1 %v1633_v2, %s1598_s0 }
  0x33   :  { %701 = vrot.lane.b32.xlu0 %v1646_v4, %s1598_s0  ;;  %703 = vrot.lane.b32.xlu1 %v1652_v5, %s1598_s0 }
  0x37   :  { %705 = vrot.lane.b32.xlu0 %v1658_v6, %s1598_s0  ;;  %707 = vrot.lane.b32.xlu1 %v1593_v7, %s1598_s0 }
  0x3b   :  { %858 = vrot.lane.b32.xlu0 %v1626_v0, %s1599_s29  ;;  %860 = vrot.lane.b32.xlu1 %v1640_v3, %s1599_s29 }
  0x3f   :  { %862 = vrot.lane.b32.xlu0 %v1646_v4, %s1599_s29  ;;  %864 = vrot.lane.b32.xlu1 %v1652_v5, %s1599_s29 }
  0x43   :  { %856 = vrot.lane.b32.xlu0 %v1633_v2, %s1599_s29  ;;  %866 = vrot.lane.b32.xlu1 %v1658_v6, %s1599_s29 }
  0x47   :  { %868 = vrot.lane.b32.xlu0 %v1593_v7, %s1599_s29  ;;  %1019 = vrot.lane.b32.xlu1 %v1626_v0, %s1600_s30 }
  0x4b   :  { %1021 = vrot.lane.b32.xlu0 %v1640_v3, %s1600_s30  ;;  %1017 = vrot.lane.b32.xlu1 %v1633_v2, %s1600_s30 }
  0x4f   :  { %1023 = vrot.lane.b32.xlu0 %v1646_v4, %s1600_s30  ;;  %1025 = vrot.lane.b32.xlu1 %v1652_v5, %s1600_s30 }
  0x53   :  { %1027 = vrot.lane.b32.xlu0 %v1658_v6, %s1600_s30  ;;  %1029 = vrot.lane.b32.xlu1 %v1593_v7, %s1600_s30 }
  0x57   :  { %1180 = vrot.lane.b32.xlu0 %v1626_v0, %s1601_s4  ;;  %1182 = vrot.lane.b32.xlu1 %v1640_v3, %s1601_s4 }
  0x5b   :  { %1184 = vrot.lane.b32.xlu0 %v1646_v4, %s1601_s4  ;;  %1186 = vrot.lane.b32.xlu1 %v1652_v5, %s1601_s4 }
  0x5f   :  { %1178 = vrot.lane.b32.xlu0 %v1633_v2, %s1601_s4  ;;  %1188 = vrot.lane.b32.xlu1 %v1658_v6, %s1601_s4 }
  0x63   :  { %1190 = vrot.lane.b32.xlu0 %v1593_v7, %s1601_s4  ;;  %1341 = vrot.lane.b32.xlu1 %v1626_v0, %s1602_s5 }
  0x67   :  { %1343 = vrot.lane.b32.xlu0 %v1640_v3, %s1602_s5  ;;  %1339 = vrot.lane.b32.xlu1 %v1633_v2, %s1602_s5 }
  0x6b   :  { %1345 = vrot.lane.b32.xlu0 %v1646_v4, %s1602_s5  ;;  %1347 = vrot.lane.b32.xlu1 %v1652_v5, %s1602_s5 }
  0x6f   :  { %1349 = vrot.lane.b32.xlu0 %v1658_v6, %s1602_s5  ;;  %1351 = vrot.lane.b32.xlu1 %v1593_v7, %s1602_s5 }
  0x73   :  { %1501 = vperm.xlu0 %1583, %v1498_v8  }
  0x75   :  { %v64_v9 = vpop.permute.xlu0 %63  ;;  %v62_v10 = vpop.permute.xlu1 %61 }
  0x76   :  { %v76_v14 = vsel %vm75_vm0, %v62_v10, %v64_v9 }
  0x79   :  { %v66_v11 = vpop.permute.xlu0 %65  ;;  %v68_v12 = vpop.permute.xlu1 %67 }
  0x7a   :  { %v77_v13 = vsel %vm75_vm0, %v64_v9, %v66_v11  ;;  %v78_v19 = vsel %vm75_vm0, %v66_v11, %v68_v12 }
  0x7b   :  { %92 = vmatprep.subr.bf16.mxu0 %v77_v13  ;;  %v1558_v13 = vld [vmem:[%s1863_s1 + $0x14] sm:$0xf] }
  0x7c   :  { %93 = vmatpush1.bf16.msra.mxu0 %v76_v14 }
  0x7d   :  { %v70_v16 = vpop.permute.xlu0 %69  ;;  %v72_v17 = vpop.permute.xlu1 %71 }
  0x7e   :  { %v79_v18 = vsel %vm75_vm0, %v68_v12, %v70_v16  ;;  %v80_v23 = vsel %vm75_vm0, %v70_v16, %v72_v17 }
  0x7f   :  { %1534 = vmatmul.mubr.msk.bf16.vlgmr.msra.gmra.mrb[0].mxu0 %vm88_vm1, %v1526_v15  ;;  %133 = vmatprep.subr.bf16.mxu1 %v79_v18 }
  0x80   :  { %134 = vmatpush1.bf16.msra.mxu1 %v78_v19  ;;  %206 = vmatprep.mubr.bf16.mxu0 %v1594_v1 }
  0x81   :  { %v74_v20 = vpop.permute.xlu0 %73  ;;  %248 = vmatprep.subr.bf16.mxu1 %v1626_v0  ;;  %v376_v21 = vpop.permute.xlu1 %375  ;;  %v1554_v0 = vld [vmem:[%s1863_s1 + $0x10] sm:$0xf] }
  0x82   :  { %v81_v22 = vsel %vm75_vm0, %v72_v17, %v74_v20 }
  0x83   :  { %1535 = vmatmul.mubr.msk.bf16.vlgmr.msra.gmra.mrb[0].mxu1 %vm88_vm1, %v1526_v15  ;;  %174 = vmatprep.subr.bf16.mxu0 %v81_v22 }
  0x84   :  { %175 = vmatpush1.bf16.msra.mxu0 %v80_v23  ;;  %249 = vmatpush1.bf16.msra.mxu1 %v1633_v2 }
  0x85   :  { %v378_v24 = vpop.permute.xlu0 %377  ;;  %289 = vmatprep.subr.bf16.mxu0 %v1646_v4  ;;  %280 = vmatprep.mubr.bf16.mxu1 %v1594_v1  ;;  %v374_v25 = vpop.permute.xlu1 %373 }
  0x86   :  { %330 = vmatprep.subr.bf16.mxu1 %v1658_v6  ;;  %v389_v26 = vsel %vm387_vm2, %v376_v21, %v378_v24  ;;  %v388_v33 = vsel %vm387_vm2, %v374_v25, %v376_v21 }
  0x87   :  { %1536 = vmatmul.mubr.msk.bf16.vlgmr.msra.gmra.mrb[4].mxu0 %vm88_vm1, %v1526_v15 }
  0x88   :  { %290 = vmatpush1.bf16.msra.mxu0 %v1640_v3  ;;  %321 = vmatprep.mubr.bf16.mxu0 %v1594_v1 }
  0x89   :  { %v380_v28 = vpop.permute.xlu0 %379  ;;  %403 = vmatprep.subr.bf16.mxu0 %v389_v26  ;;  %v382_v29 = vpop.permute.xlu1 %381  ;;  %v1562_v26 = vld [vmem:[%s1863_s1 + $0x18] sm:$0xf] }
  0x8a   :  { %v391_v30 = vsel %vm387_vm2, %v380_v28, %v382_v29  ;;  %v390_v37 = vsel %vm387_vm2, %v378_v24, %v380_v28 }
  0x8b   :  { %1543 = vmatmul.mubr.msk.bf16.vlgmr.msra.gmra.mrb[4].mxu1 %vm88_vm1, %v21_v27 }
  0x8c   :  { %331 = vmatpush1.bf16.msra.mxu1 %v1652_v5  ;;  %362 = vmatprep.mubr.bf16.mxu1 %v1594_v1 }
  0x8d   :  { %444 = vmatprep.subr.bf16.mxu1 %v391_v30  ;;  %v384_v31 = vpop.permute.xlu0 %383  ;;  %v386_v32 = vpop.permute.xlu1 %385 }
  0x8e   :  { %v393_v34 = vsel %vm387_vm2, %v384_v31, %v386_v32  ;;  %v392_v42 = vsel %vm387_vm2, %v382_v29, %v384_v31 }
  0x8f   :  { %1544 = vmatmul.mubr.msk.bf16.vlgmr.msra.gmra.mrb[8].mxu0 %vm88_vm1, %v21_v27 }
  0x90   :  { %404 = vmatpush1.bf16.msra.mxu0 %v388_v33  ;;  %435 = vmatprep.mubr.bf16.mxu0 %v1594_v1 }
  0x91   :  { %485 = vmatprep.subr.bf16.mxu0 %v393_v34  ;;  %v537_v35 = vpop.permute.xlu0 %536  ;;  %v539_v36 = vpop.permute.xlu1 %538 }
  0x92   :  { %v550_v38 = vsel %vm548_vm3, %v537_v35, %v539_v36 }
  0x93   :  { %1545 = vmatmul.mubr.msk.bf16.vlgmr.msra.gmra.mrb[8].mxu1 %vm88_vm1, %v21_v27 }
  0x94   :  { %445 = vmatpush1.bf16.msra.mxu1 %v390_v37  ;;  %476 = vmatprep.mubr.bf16.mxu1 %v1594_v1 }
  0x95   :  { %564 = vmatprep.subr.bf16.mxu1 %v550_v38  ;;  %v541_v40 = vpop.permute.xlu0 %540  ;;  %v543_v41 = vpop.permute.xlu1 %542 }
  0x96   :  { %v552_v43 = vsel %vm548_vm3, %v541_v40, %v543_v41  ;;  %v551_v50 = vsel %vm548_vm3, %v539_v36, %v541_v40 }
  0x97   :  { %1547 = vmatmul.mubr.msk.bf16.vlgmr.msra.gmra.mrb[12].mxu0 %vm88_vm1, %v1546_v39 }
  0x98   :  { %486 = vmatpush1.bf16.msra.mxu0 %v392_v42  ;;  %517 = vmatprep.mubr.bf16.mxu0 %v1594_v1 }
  0x99   :  { %605 = vmatprep.subr.bf16.mxu0 %v552_v43  ;;  %v535_v44 = vpop.permute.xlu0 %534  ;;  %v545_v46 = vpop.permute.xlu1 %544 }
  0x9a   :  { %v549_v45 = vsel %vm548_vm3, %v535_v44, %v537_v35  ;;  %v553_v55 = vsel %vm548_vm3, %v543_v41, %v545_v46  ;;  %v1566_v41 = vld [vmem:[%s1863_s1 + $0x1c] sm:$0xf] }
  0x9b   :  { %1548 = vmatmul.mubr.msk.bf16.vlgmr.msra.gmra.mrb[12].mxu1 %vm88_vm1, %v1546_v39 }
  0x9c   :  { %565 = vmatpush1.bf16.msra.mxu1 %v549_v45  ;;  %596 = vmatprep.mubr.bf16.mxu1 %v1594_v1 }
  0x9d   :  { %v547_v47 = vpop.permute.xlu0 %546  ;;  %v698_v48 = vpop.permute.xlu1 %697 }
  0x9e   :  { %v554_v49 = vsel %vm548_vm3, %v545_v46, %v547_v47 }
  0x9f   :  { %1549 = vmatmul.mubr.msk.bf16.vlgmr.msra.gmra.mrb[16].mxu0 %vm88_vm1, %v1546_v39  ;;  %646 = vmatprep.subr.bf16.mxu1 %v554_v49 }
  0xa0   :  { %606 = vmatpush1.bf16.msra.mxu0 %v551_v50  ;;  %637 = vmatprep.mubr.bf16.mxu0 %v1594_v1  ;;  %v1570_v50 = vld [vmem:[%s1863_s1 + $0x20] sm:$0xf] }
  0xa1   :  { %v700_v52 = vpop.permute.xlu0 %699  ;;  %v696_v53 = vpop.permute.xlu1 %695 }
  0xa2   :  { %v711_v54 = vsel %vm709_vm4, %v698_v48, %v700_v52  ;;  %v710_v58 = vsel %vm709_vm4, %v696_v53, %v698_v48 }
  0xa3   :  { %1551 = vmatmul.mubr.msk.bf16.vlgmr.msra.gmra.mrb[16].mxu1 %vm88_vm1, %v1550_v51  ;;  %725 = vmatprep.subr.bf16.mxu0 %v711_v54 }
  0xa4   :  { %647 = vmatpush1.bf16.msra.mxu1 %v553_v55  ;;  %678 = vmatprep.mubr.bf16.mxu1 %v1594_v1 }
  0xa5   :  { %v702_v56 = vpop.permute.xlu0 %701  ;;  %v704_v57 = vpop.permute.xlu1 %703 }
  0xa6   :  { %v713_v59 = vsel %vm709_vm4, %v702_v56, %v704_v57  ;;  %v712_v62 = vsel %vm709_vm4, %v700_v52, %v702_v56 }
  0xa7   :  { %1552 = vmatmul.mubr.msk.bf16.vlgmr.msra.gmra.mrb[20].mxu0 %vm88_vm1, %v1550_v51  ;;  %766 = vmatprep.subr.bf16.mxu1 %v713_v59 }
  0xa8   :  { %726 = vmatpush1.bf16.msra.mxu0 %v710_v58  ;;  %757 = vmatprep.mubr.bf16.mxu0 %v1594_v1 }
  0xa9   :  { %v706_v60 = vpop.permute.xlu0 %705  ;;  %v708_v61 = vpop.permute.xlu1 %707 }
  0xaa   :  { %v715_v63 = vsel %vm709_vm4, %v706_v60, %v708_v61  ;;  %v714_v4 = vsel %vm709_vm4, %v704_v57, %v706_v60 }
  0xab   :  { %1553 = vmatmul.mubr.msk.bf16.vlgmr.msra.gmra.mrb[20].mxu1 %vm88_vm1, %v1550_v51  ;;  %807 = vmatprep.subr.bf16.mxu0 %v715_v63 }
  0xac   :  { %767 = vmatpush1.bf16.msra.mxu1 %v712_v62  ;;  %798 = vmatprep.mubr.bf16.mxu1 %v1594_v1 }
  0xad   :  { %v859_v2 = vpop.permute.xlu0 %858  ;;  %v861_v3 = vpop.permute.xlu1 %860 }
  0xae   :  { %v872_v5 = vsel %vm870_vm5, %v859_v2, %v861_v3 }
  0xaf   :  { %1555 = vmatmul.mubr.msk.bf16.vlgmr.msra.gmra.mrb[24].mxu0 %vm88_vm1, %v1554_v0  ;;  %886 = vmatprep.subr.bf16.mxu1 %v872_v5 }
  0xb0   :  { %808 = vmatpush1.bf16.msra.mxu0 %v714_v4  ;;  %839 = vmatprep.mubr.bf16.mxu0 %v1594_v1 }
  0xb1   :  { %v863_v6 = vpop.permute.xlu0 %862  ;;  %v865_v7 = vpop.permute.xlu1 %864 }
  0xb2   :  { %v874_v8 = vsel %vm870_vm5, %v863_v6, %v865_v7  ;;  %v873_v12 = vsel %vm870_vm5, %v861_v3, %v863_v6 }
  0xb3   :  { %1556 = vmatmul.mubr.msk.bf16.vlgmr.msra.gmra.mrb[24].mxu1 %vm88_vm1, %v1554_v0  ;;  %927 = vmatprep.subr.bf16.mxu0 %v874_v8 }
  0xb4   :  { %918 = vmatprep.mubr.bf16.mxu1 %v1594_v1 }
  0xb5   :  { %v857_v9 = vpop.permute.xlu0 %856  ;;  %v867_v11 = vpop.permute.xlu1 %866 }
  0xb6   :  { %v871_v10 = vsel %vm870_vm5, %v857_v9, %v859_v2  ;;  %v875_v17 = vsel %vm870_vm5, %v865_v7, %v867_v11 }
  0xb7   :  { %1557 = vmatmul.mubr.msk.bf16.vlgmr.msra.gmra.mrb[28].mxu0 %vm88_vm1, %v1554_v0  ;;  %887 = vmatpush1.bf16.msra.mxu1 %v871_v10 }
  0xb8   :  { %928 = vmatpush1.bf16.msra.mxu0 %v873_v12  ;;  %959 = vmatprep.mubr.bf16.mxu0 %v1594_v1 }
  0xb9   :  { %v869_v14 = vpop.permute.xlu0 %868  ;;  %v1020_v15 = vpop.permute.xlu1 %1019 }
  0xba   :  { %v876_v16 = vsel %vm870_vm5, %v867_v11, %v869_v14 }
  0xbb   :  { %1559 = vmatmul.mubr.msk.bf16.vlgmr.msra.gmra.mrb[28].mxu1 %vm88_vm1, %v1558_v13  ;;  %968 = vmatprep.subr.bf16.mxu1 %v876_v16 }
  0xbc   :  { %969 = vmatpush1.bf16.msra.mxu1 %v875_v17  ;;  %1000 = vmatprep.mubr.bf16.mxu1 %v1594_v1 }
  0xbd   :  { %v1022_v18 = vpop.permute.xlu0 %1021  ;;  %v1018_v19 = vpop.permute.xlu1 %1017 }
  0xbe   :  { %v1033_v20 = vsel %vm1031_vm6, %v1020_v15, %v1022_v18  ;;  %v1032_v21 = vsel %vm1031_vm6, %v1018_v19, %v1020_v15 }
  0xbf   :  { %1560 = vmatmul.mubr.msk.bf16.vlgmr.msra.gmra.mrb[32].mxu0 %vm88_vm1, %v1558_v13  ;;  %1047 = vmatprep.subr.bf16.mxu0 %v1033_v20 }
  0xc0   :  { %1048 = vmatpush1.bf16.msra.mxu0 %v1032_v21  ;;  %1079 = vmatprep.mubr.bf16.mxu0 %v1594_v1 }
  0xc1   :  { %v1024_v22 = vpop.permute.xlu0 %1023  ;;  %v1026_v24 = vpop.permute.xlu1 %1025 }
  0xc2   :  { %v1034_v23 = vsel %vm1031_vm6, %v1022_v18, %v1024_v22  ;;  %v1035_v25 = vsel %vm1031_vm6, %v1024_v22, %v1026_v24 }
  0xc3   :  { %1561 = vmatmul.mubr.msk.bf16.vlgmr.msra.gmra.mrb[32].mxu1 %vm88_vm1, %v1558_v13  ;;  %1088 = vmatprep.subr.bf16.mxu1 %v1035_v25 }
  0xc4   :  { %1120 = vmatprep.mubr.bf16.mxu1 %v1594_v1  ;;  %1089 = vmatpush1.bf16.msra.mxu1 %v1034_v23 }
  0xc5   :  { %v1028_v27 = vpop.permute.xlu0 %1027  ;;  %v1030_v29 = vpop.permute.xlu1 %1029 }
  0xc6   :  { %v1036_v28 = vsel %vm1031_vm6, %v1026_v24, %v1028_v27  ;;  %v1037_v30 = vsel %vm1031_vm6, %v1028_v27, %v1030_v29 }
  0xc7   :  { %1563 = vmatmul.mubr.msk.bf16.vlgmr.msra.gmra.mrb[36].mxu0 %vm88_vm1, %v1562_v26  ;;  %1129 = vmatprep.subr.bf16.mxu0 %v1037_v30 }
  0xc8   :  { %1161 = vmatprep.mubr.bf16.mxu0 %v1594_v1  ;;  %1130 = vmatpush1.bf16.msra.mxu0 %v1036_v28 }
  0xc9   :  { %v1181_v31 = vpop.permute.xlu0 %1180  ;;  %v1183_v32 = vpop.permute.xlu1 %1182 }
  0xca   :  { %v1194_v33 = vsel %vm1192_vm7, %v1181_v31, %v1183_v32 }
  0xcb   :  { %1564 = vmatmul.mubr.msk.bf16.vlgmr.msra.gmra.mrb[36].mxu1 %vm88_vm1, %v1562_v26  ;;  %1208 = vmatprep.subr.bf16.mxu1 %v1194_v33 }
  0xcc   :  { %1240 = vmatprep.mubr.bf16.mxu1 %v1594_v1 }
  0xcd   :  { %v1185_v34 = vpop.permute.xlu0 %1184  ;;  %v1187_v36 = vpop.permute.xlu1 %1186 }
  0xce   :  { %v1195_v35 = vsel %vm1192_vm7, %v1183_v32, %v1185_v34  ;;  %v1196_v37 = vsel %vm1192_vm7, %v1185_v34, %v1187_v36 }
  0xcf   :  { %1565 = vmatmul.mubr.msk.bf16.vlgmr.msra.gmra.mrb[40].mxu0 %vm88_vm1, %v1562_v26  ;;  %1249 = vmatprep.subr.bf16.mxu0 %v1196_v37 }
  0xd0   :  { %1281 = vmatprep.mubr.bf16.mxu0 %v1594_v1  ;;  %1250 = vmatpush1.bf16.msra.mxu0 %v1195_v35 }
  0xd1   :  { %v1179_v38 = vpop.permute.xlu0 %1178  ;;  %v1189_v40 = vpop.permute.xlu1 %1188 }
  0xd2   :  { %v1193_v39 = vsel %vm1192_vm7, %v1179_v38, %v1181_v31  ;;  %v1197_v45 = vsel %vm1192_vm7, %v1187_v36, %v1189_v40 }
  0xd3   :  { %1209 = vmatpush1.bf16.msra.mxu1 %v1193_v39 }
  0xd5   :  { %v1191_v42 = vpop.permute.xlu0 %1190  ;;  %v1342_v43 = vpop.permute.xlu1 %1341 }
  0xd6   :  { %1567 = vmatmul.mubr.msk.bf16.vlgmr.msra.gmra.mrb[40].mxu1 %vm88_vm1, %v1566_v41  ;;  %v1198_v44 = vsel %vm1192_vm7, %v1189_v40, %v1191_v42 }
  0xd7   :  { %1568 = vmatmul.mubr.msk.bf16.vlgmr.msra.gmra.mrb[44].mxu0 %vm88_vm1, %v1566_v41  ;;  %1290 = vmatprep.subr.bf16.mxu1 %v1198_v44 }
  0xd8   :  { %1291 = vmatpush1.bf16.msra.mxu1 %v1197_v45  ;;  %1322 = vmatprep.mubr.bf16.mxu1 %v1594_v1 }
  0xd9   :  { %v1344_v46 = vpop.permute.xlu0 %1343  ;;  %1401 = vmatprep.mubr.bf16.mxu0 %v1594_v1  ;;  %v1340_v47 = vpop.permute.xlu1 %1339 }
  0xda   :  { %v1355_v48 = vsel %vm1353_vm8, %v1342_v43, %v1344_v46  ;;  %v1354_v49 = vsel %vm1353_vm8, %v1340_v47, %v1342_v43 }
  0xdb   :  { %1369 = vmatprep.subr.bf16.mxu0 %v1355_v48 }
  0xdc   :  { %1370 = vmatpush1.bf16.msra.mxu0 %v1354_v49 }
  0xdd   :  { %v1346_v51 = vpop.permute.xlu0 %1345  ;;  %v1348_v53 = vpop.permute.xlu1 %1347 }
  0xde   :  { %v1356_v52 = vsel %vm1353_vm8, %v1344_v46, %v1346_v51  ;;  %1569 = vmatmul.mubr.msk.bf16.vlgmr.msra.gmra.mrb[44].mxu1 %vm88_vm1, %v1566_v41  ;;  %v1357_v54 = vsel %vm1353_vm8, %v1346_v51, %v1348_v53 }
  0xdf   :  { %1571 = vmatmul.mubr.msk.bf16.vlgmr.msra.gmra.mrb[48].mxu0 %vm88_vm1, %v1570_v50  ;;  %1442 = vmatprep.mubr.bf16.mxu1 %v1594_v1 }
  0xe0   :  { %1410 = vmatprep.subr.bf16.mxu1 %v1357_v54  ;;  %1483 = vmatprep.mubr.bf16.mxu0 %v1594_v1 }
  0xe1   :  { %1411 = vmatpush1.bf16.msra.mxu1 %v1356_v52  ;;  %v1350_v55 = vpop.permute.xlu0 %1349  ;;  %v1352_v57 = vpop.permute.xlu1 %1351 }
  0xe2   :  { %v1358_v56 = vsel %vm1353_vm8, %v1348_v53, %v1350_v55  ;;  %v1359_v58 = vsel %vm1353_vm8, %v1350_v55, %v1352_v57 }
  0xe3   :  { %1451 = vmatprep.subr.bf16.mxu0 %v1359_v58 }
  0xe4   :  { %1452 = vmatpush1.bf16.msra.mxu0 %v1358_v56 }
  0xe6   :  { %1572 = vmatmul.mubr.msk.bf16.vlgmr.msra.gmra.mrb[48].mxu1 %vm88_vm1, %v1570_v50 }
  0xe7   :  { %1573 = vmatmul.mubr.msk.bf16.vlgmr.msra.gmra.mrb[52].mxu0 %vm88_vm1, %v1570_v50 }
 0x152   :  { %v126_v59 = vpop.f32.mrb[0].mxu0 }
 0x153   :  { %v128_v60 = vpop.f32.mrb[1].mxu0 }
 0x154   :  { %v130_v61 = vpop.f32.mrb[2].mxu0 }
 0x155   :  { %v131_v62 = vpop.f32.mrb[3].mxu0 }
 0x156   :  { %v167_v63 = vpop.f32.mrb[0].mxu1 }
 0x157   :  { %v169_v0 = vpop.f32.mrb[1].mxu1 }
 0x158   :  { %v171_v1 = vpop.f32.mrb[2].mxu1 }
 0x159   :  { %v172_v2 = vpop.f32.mrb[3].mxu1 }
 0x15a   :  { %v208_v3 = vpop.f32.mrb[4].mxu0 }
 0x15b   :  { %v210_v4 = vpop.f32.mrb[5].mxu0 }
 0x15c   :  { %v212_v5 = vpop.f32.mrb[6].mxu0 }
 0x15d   :  { %v213_v6 = vpop.f32.mrb[7].mxu0 }
 0x15e   :  { %v282_v7 = vpop.f32.mrb[4].mxu1 }
 0x15f   :  { %v283_v8 = vadd.f32 %v282_v7, %v126_v59  ;;  %v284_v9 = vpop.f32.mrb[5].mxu1 }
 0x160   :  { %v285_v10 = vadd.f32 %v284_v9, %v128_v60  ;;  %v286_v11 = vpop.f32.mrb[6].mxu1 }
 0x161   :  { %v287_v12 = vpop.f32.mrb[7].mxu1 }
 0x162   :  { %v323_v13 = vpop.f32.mrb[8].mxu0 }
 0x163   :  { %v324_v14 = vadd.f32 %v323_v13, %v167_v63  ;;  %v325_v15 = vpop.f32.mrb[9].mxu0 }
 0x164   :  { %v326_v16 = vadd.f32 %v325_v15, %v169_v0  ;;  %v327_v17 = vpop.f32.mrb[10].mxu0 }
 0x165   :  { %v328_v18 = vpop.f32.mrb[11].mxu0 }
 0x166   :  { %v364_v19 = vpop.f32.mrb[8].mxu1 }
 0x167   :  { %v365_v20 = vadd.f32 %v364_v19, %v208_v3  ;;  %v366_v21 = vpop.f32.mrb[9].mxu1 }
 0x168   :  { %v367_v22 = vadd.f32 %v366_v21, %v210_v4  ;;  %v368_v23 = vpop.f32.mrb[10].mxu1 }
 0x169   :  { %v369_v24 = vpop.f32.mrb[11].mxu1 }
 0x16a   :  { %v437_v25 = vpop.f32.mrb[12].mxu0 }
 0x16b   :  { %v526_v26 = vadd.f32 %v437_v25, %v283_v8  ;;  %v439_v27 = vpop.f32.mrb[13].mxu0 }
 0x16c   :  { %v527_v28 = vadd.f32 %v439_v27, %v285_v10  ;;  %v441_v29 = vpop.f32.mrb[14].mxu0 }
 0x16d   :  { %v442_v30 = vpop.f32.mrb[15].mxu0 }
 0x16e   :  { %v478_v31 = vpop.f32.mrb[12].mxu1 }
 0x16f   :  { %v528_v32 = vadd.f32 %v478_v31, %v324_v14  ;;  %v480_v33 = vpop.f32.mrb[13].mxu1 }
 0x170   :  { %v529_v34 = vadd.f32 %v480_v33, %v326_v16  ;;  %v482_v35 = vpop.f32.mrb[14].mxu1 }
 0x171   :  { %v483_v36 = vpop.f32.mrb[15].mxu1 }
 0x172   :  { %v519_v37 = vpop.f32.mrb[16].mxu0 }
 0x173   :  { %v530_v38 = vadd.f32 %v519_v37, %v365_v20  ;;  %v521_v39 = vpop.f32.mrb[17].mxu0 }
 0x174   :  { %v531_v40 = vadd.f32 %v521_v39, %v367_v22  ;;  %v523_v41 = vpop.f32.mrb[18].mxu0 }
 0x175   :  { %v524_v42 = vpop.f32.mrb[19].mxu0 }
 0x176   :  { %v598_v43 = vpop.f32.mrb[16].mxu1 }
 0x177   :  { %v687_v44 = vadd.f32 %v598_v43, %v526_v26  ;;  %v600_v45 = vpop.f32.mrb[17].mxu1 }
 0x178   :  { %v688_v46 = vadd.f32 %v600_v45, %v527_v28  ;;  %v602_v47 = vpop.f32.mrb[18].mxu1 }
 0x179   :  { %v603_v48 = vpop.f32.mrb[19].mxu1 }
 0x17a   :  { %v639_v49 = vpop.f32.mrb[20].mxu0 }
 0x17b   :  { %v689_v50 = vadd.f32 %v639_v49, %v528_v32  ;;  %v641_v51 = vpop.f32.mrb[21].mxu0 }
 0x17c   :  { %v690_v52 = vadd.f32 %v641_v51, %v529_v34  ;;  %v643_v53 = vpop.f32.mrb[22].mxu0 }
 0x17d   :  { %v644_v54 = vpop.f32.mrb[23].mxu0 }
 0x17e   :  { %v680_v55 = vpop.f32.mrb[20].mxu1 }
 0x17f   :  { %v691_v56 = vadd.f32 %v680_v55, %v530_v38  ;;  %v682_v57 = vpop.f32.mrb[21].mxu1 }
 0x180   :  { %v692_v58 = vadd.f32 %v682_v57, %v531_v40  ;;  %v684_v59 = vpop.f32.mrb[22].mxu1 }
 0x181   :  { %v685_v60 = vpop.f32.mrb[23].mxu1 }
 0x182   :  { %v759_v61 = vpop.f32.mrb[24].mxu0 }
 0x183   :  { %v848_v62 = vadd.f32 %v759_v61, %v687_v44  ;;  %v761_v63 = vpop.f32.mrb[25].mxu0 }
 0x184   :  { %v849_v0 = vadd.f32 %v761_v63, %v688_v46  ;;  %v763_v1 = vpop.f32.mrb[26].mxu0 }
 0x185   :  { %v764_v2 = vpop.f32.mrb[27].mxu0 }
 0x186   :  { %v800_v3 = vpop.f32.mrb[24].mxu1 }
 0x187   :  { %v850_v4 = vadd.f32 %v800_v3, %v689_v50  ;;  %v802_v5 = vpop.f32.mrb[25].mxu1 }
 0x188   :  { %v851_v6 = vadd.f32 %v802_v5, %v690_v52  ;;  %v804_v7 = vpop.f32.mrb[26].mxu1 }
 0x189   :  { %v805_v8 = vpop.f32.mrb[27].mxu1 }
 0x18a   :  { %v841_v9 = vpop.f32.mrb[28].mxu0 }
 0x18b   :  { %v852_v10 = vadd.f32 %v841_v9, %v691_v56  ;;  %v843_v11 = vpop.f32.mrb[29].mxu0 }
 0x18c   :  { %v853_v12 = vadd.f32 %v843_v11, %v692_v58  ;;  %v845_v13 = vpop.f32.mrb[30].mxu0 }
 0x18d   :  { %v846_v14 = vpop.f32.mrb[31].mxu0 }
 0x18e   :  { %v920_v15 = vpop.f32.mrb[28].mxu1 }
 0x18f   :  { %v1009_v16 = vadd.f32 %v920_v15, %v848_v62  ;;  %v922_v17 = vpop.f32.mrb[29].mxu1 }
 0x190   :  { %v1010_v18 = vadd.f32 %v922_v17, %v849_v0  ;;  %v924_v19 = vpop.f32.mrb[30].mxu1  ;;  %v1502_v0 = vpop.permute.xlu0 %1501 }
 0x191   :  { %v925_v20 = vpop.f32.mrb[31].mxu1 }
 0x192   :  { %v961_v21 = vpop.f32.mrb[32].mxu0 }
 0x193   :  { %v1011_v22 = vadd.f32 %v961_v21, %v850_v4  ;;  %v963_v23 = vpop.f32.mrb[33].mxu0 }
 0x194   :  { %v1012_v24 = vadd.f32 %v963_v23, %v851_v6  ;;  %v965_v25 = vpop.f32.mrb[34].mxu0 }
 0x195   :  { %v966_v26 = vpop.f32.mrb[35].mxu0 }
 0x196   :  { %v1002_v27 = vpop.f32.mrb[32].mxu1 }
 0x197   :  { %v1013_v28 = vadd.f32 %v1002_v27, %v852_v10  ;;  %v1004_v29 = vpop.f32.mrb[33].mxu1 }
 0x198   :  { %v1014_v30 = vadd.f32 %v1004_v29, %v853_v12  ;;  %v1006_v31 = vpop.f32.mrb[34].mxu1 }
 0x199   :  { %v1007_v32 = vpop.f32.mrb[35].mxu1 }
 0x19a   :  { %v1081_v33 = vpop.f32.mrb[36].mxu0 }
 0x19b   :  { %v1170_v34 = vadd.f32 %v1081_v33, %v1009_v16  ;;  %v1083_v35 = vpop.f32.mrb[37].mxu0 }
 0x19c   :  { %v1171_v36 = vadd.f32 %v1083_v35, %v1010_v18  ;;  %v1085_v37 = vpop.f32.mrb[38].mxu0 }
 0x19d   :  { %v1086_v38 = vpop.f32.mrb[39].mxu0 }
 0x19e   :  { %v1122_v39 = vpop.f32.mrb[36].mxu1 }
 0x19f   :  { %v1172_v40 = vadd.f32 %v1122_v39, %v1011_v22  ;;  %v1124_v41 = vpop.f32.mrb[37].mxu1 }
 0x1a0   :  { %v1173_v42 = vadd.f32 %v1124_v41, %v1012_v24  ;;  %v1126_v43 = vpop.f32.mrb[38].mxu1 }
 0x1a1   :  { %v1127_v44 = vpop.f32.mrb[39].mxu1 }
 0x1a2   :  { %v1163_v45 = vpop.f32.mrb[40].mxu0 }
 0x1a3   :  { %v1174_v46 = vadd.f32 %v1163_v45, %v1013_v28  ;;  %v1165_v47 = vpop.f32.mrb[41].mxu0 }
 0x1a4   :  { %v1175_v48 = vadd.f32 %v1165_v47, %v1014_v30  ;;  %v1167_v49 = vpop.f32.mrb[42].mxu0 }
 0x1a5   :  { %v1168_v50 = vpop.f32.mrb[43].mxu0 }
 0x1a9   :  { %v1242_v51 = vpop.f32.mrb[40].mxu1 }
 0x1aa   :  { %v1331_v52 = vadd.f32 %v1242_v51, %v1170_v34  ;;  %v1244_v53 = vpop.f32.mrb[41].mxu1  ;;  %v1283_v54 = vpop.f32.mrb[44].mxu0 }
 0x1ab   :  { %v1332_v55 = vadd.f32 %v1244_v53, %v1171_v36  ;;  %v1333_v56 = vadd.f32 %v1283_v54, %v1172_v40  ;;  %v1285_v57 = vpop.f32.mrb[45].mxu0  ;;  %v1246_v58 = vpop.f32.mrb[42].mxu1 }
 0x1ac   :  { %v1334_v59 = vadd.f32 %v1285_v57, %v1173_v42  ;;  %v1287_v60 = vpop.f32.mrb[46].mxu0  ;;  %v1247_v61 = vpop.f32.mrb[43].mxu1 }
 0x1ad   :  { %v1288_v62 = vpop.f32.mrb[47].mxu0 }
 0x1b1   :  { %v1324_v63 = vpop.f32.mrb[44].mxu1 }
 0x1b2   :  { %v1335_v1 = vadd.f32 %v1324_v63, %v1174_v46  ;;  %v1326_v2 = vpop.f32.mrb[45].mxu1  ;;  %v1403_v3 = vpop.f32.mrb[48].mxu0 }
 0x1b3   :  { %v1336_v4 = vadd.f32 %v1326_v2, %v1175_v48  ;;  %v1492_v5 = vadd.f32 %v1403_v3, %v1331_v52  ;;  %v1405_v6 = vpop.f32.mrb[49].mxu0  ;;  %v1328_v7 = vpop.f32.mrb[46].mxu1 }
 0x1b4   :  { %v1493_v8 = vadd.f32 %v1405_v6, %v1332_v55  ;;  %v1407_v9 = vpop.f32.mrb[50].mxu0  ;;  %v1329_v10 = vpop.f32.mrb[47].mxu1 }
 0x1b5   :  { %v1504_v11 = vadd.f32 %v1502_v0, %v1492_v5  ;;  %v1408_v12 = vpop.f32.mrb[51].mxu0 }
 0x1b6   :  { %v1505_v13 = vadd.f32 %v1502_v0, %v1493_v8 }
 0x1b7   :  { %v1510_v14 = vmax.f32 %v1504_v11, 0.0 }
 0x1b8   :  { %v1511_v15 = vmax.f32 %v1505_v13, 0.0 }
 0x1b9   :  { %1516 = vst [vmem:[%s1864_s3] sm:$0xff] %v1510_v14  ;;  %v1444_v16 = vpop.f32.mrb[48].mxu1 }
 0x1ba   :  { %1517 = vst [vmem:[%s1864_s3 + $0x8] sm:$0xff] %v1511_v15  ;;  %v1494_v17 = vadd.f32 %v1444_v16, %v1333_v56  ;;  %v1446_v18 = vpop.f32.mrb[49].mxu1  ;;  %v1485_v20 = vpop.f32.mrb[52].mxu0 }
 0x1bb   :  { %v1495_v19 = vadd.f32 %v1446_v18, %v1334_v59  ;;  %v1448_v21 = vpop.f32.mrb[50].mxu1  ;;  %v1496_v23 = vadd.f32 %v1485_v20, %v1335_v1  ;;  %v1487_v24 = vpop.f32.mrb[53].mxu0 }
 0x1bc   :  { %v1506_v22 = vadd.f32 %v1502_v0, %v1494_v17  ;;  %v1449_v25 = vpop.f32.mrb[51].mxu1  ;;  %v1497_v27 = vadd.f32 %v1487_v24, %v1336_v4  ;;  %v1489_v28 = vpop.f32.mrb[54].mxu0 }
 0x1bd   :  { %v1507_v26 = vadd.f32 %v1502_v0, %v1495_v19  ;;  %v1508_v30 = vadd.f32 %v1502_v0, %v1496_v23  ;;  %v1490_v31 = vpop.f32.mrb[55].mxu0 }
 0x1be   :  { %v1512_v29 = vmax.f32 %v1506_v22, 0.0  ;;  %v1509_v33 = vadd.f32 %v1502_v0, %v1497_v27 }
 0x1bf   :  { %v1513_v32 = vmax.f32 %v1507_v26, 0.0  ;;  %v1514_v34 = vmax.f32 %v1508_v30, 0.0 }
 0x1c0   :  { %1518 = vst [vmem:[%s1864_s3 + $0x10] sm:$0xff] %v1512_v29  ;;  %v1515_v35 = vmax.f32 %v1509_v33, 0.0 }
 0x1c1   :  { %1519 = vst [vmem:[%s1864_s3 + $0x18] sm:$0xff] %v1513_v32  ;;  %1520 = vst [vmem:[%s1864_s3 + $0x20] sm:$0xff] %v1514_v34 }
 0x1c2   :  { %1521 = vst [vmem:[%s1864_s3 + $0x28] sm:$0xff] %v1515_v35 }

</bundles_post_ra>
